<compile_context>
chip_gen: v7x
topology: tpu7x:2x2x1
jax: 0.10.0
libtpu: 0.0.40
codegen_flags: <defaults>
</compile_context>

<pallas_src>
import math

import jax
import jax.numpy as jnp
from jax.experimental import pallas as pl
from jax.experimental.pallas import tpu as pltpu


def _round_up(x, m):
    return ((x + m - 1) // m) * m


# --------------------------- kernels ---------------------------------------


def _linear_kernel_single_k(x_ref, w_ref, b_ref, o_ref):
    """Whole contraction dim resident: no accumulator needed."""
    acc = jnp.dot(x_ref[...], w_ref[...], preferred_element_type=jnp.float32)
    o_ref[...] = (acc + b_ref[...]).astype(o_ref.dtype)


def _linear_kernel_multi_k_accout(x_ref, w_ref, b_ref, o_ref):
    """f32 output: accumulate directly into the resident output block."""
    k = pl.program_id(2)

    @pl.when(k == 0)
    def _():
        o_ref[...] = jnp.broadcast_to(b_ref[...], o_ref.shape)

    o_ref[...] += jnp.dot(
        x_ref[...], w_ref[...], preferred_element_type=jnp.float32
    )


def _linear_kernel_multi_k_scratch(x_ref, w_ref, b_ref, o_ref, acc_ref):
    """Non-f32 output: f32 scratch accumulator, cast on the last K step."""
    k = pl.program_id(2)

    @pl.when(k == 0)
    def _():
        acc_ref[...] = jnp.broadcast_to(b_ref[...], acc_ref.shape)

    acc_ref[...] += jnp.dot(
        x_ref[...], w_ref[...], preferred_element_type=jnp.float32
    )

    @pl.when(k == pl.num_programs(2) - 1)
    def _():
        o_ref[...] = acc_ref[...].astype(o_ref.dtype)


# --------------------------- tiling helpers ---------------------------------


def _chip_defaults():
    """Generation-aware tile and VMEM-limit defaults."""
    try:
        kind = jax.devices()[0].device_kind.lower()
    except Exception:  # pragma: no cover - defensive
        kind = ""
    if "v7" in kind:
        # 64 MiB VMEM per TC: 512x1024 reaches compute-bound at ~10 MiB.
        return dict(tm=512, tn=1024, tk=1024, vmem=48 << 20)
    if "v6" in kind:
        # 128 MiB VMEM, needs ~650 flop/byte: go big and raise the limit.
        return dict(tm=1024, tn=2048, tk=2048, vmem=96 << 20)
    if "v5" in kind:
        # v5e only needs ~240 flop/byte; keep tk >= 512.
        return dict(tm=512, tn=768, tk=1024, vmem=96 << 20)
    # Unknown chip: conservative on VMEM.
    return dict(tm=512, tn=1024, tk=1024, vmem=48 << 20)


def _shrink_tiles_for_vmem(tm, tn, tk, K_pad, in_bytes, out_bytes, f32_out, budget):
    """Halve tiles (tk -> tn -> tm) until the estimated footprint fits."""

    def footprint(tm_, tn_, tk_):
        k_steps = max(K_pad // tk_, 1)
        fp = 2 * tm_ * tk_ * in_bytes      # x tile, double-buffered
        fp += 2 * tk_ * tn_ * in_bytes     # W tile, double-buffered
        fp += 2 * tn_ * 4                  # bias tile
        fp += 2 * tm_ * tn_ * out_bytes    # output tile, double-buffered
        if k_steps > 1 and not f32_out:
            fp += tm_ * tn_ * 4            # f32 accumulator scratch
        return fp

    while footprint(tm, tn, tk) > budget:
        if tk > 512 and tk % 256 == 0:
            tk //= 2
        elif tn > 256 and tn % 256 == 0:
            tn //= 2
        elif tm > 128 and tm % 32 == 0:
            tm //= 2
        else:
            break
    return tm, tn, tk


# --------------------------- module -----------------------------------------


class ProjectionLayer:
    """torch.nn.Linear(in_dim, out_dim) forward as a Pallas TPU kernel.

    Weights are stored pre-transposed ([in_dim, out_dim]), pre-cast to the MXU
    input dtype and pre-padded to the tile grid at construction time, so the
    per-call hot path only pads/casts the activations.
    """

    def __init__(self, w_t, b, *, compute_dtype=jnp.bfloat16,
                 tm=None, tn=None, tk=None, vmem_limit_bytes=None):
        in_dim, out_dim = w_t.shape
        self.in_dim, self.out_dim = in_dim, out_dim
        self.compute_dtype = compute_dtype

        d = _chip_defaults()
        tm = d["tm"] if tm is None else tm
        tn = d["tn"] if tn is None else tn
        tk = d["tk"] if tk is None else tk
        self.vmem_limit_bytes = d["vmem"] if vmem_limit_bytes is None else vmem_limit_bytes

        # Weight-side tiles depend only on (in_dim, out_dim): fix them now.
        self.tm_max = tm
        self.tn = min(tn, _round_up(out_dim, 128))   # lane-dense output tiles
        self.tk = min(tk, _round_up(in_dim, 128))

        self.K_pad = _round_up(in_dim, self.tk)
        self.N_pad = _round_up(out_dim, self.tn)

        # One-time weight/bias preparation (outside the per-call hot path).
        w = jnp.asarray(w_t, dtype=compute_dtype)
        if (self.K_pad, self.N_pad) != (in_dim, out_dim):
            w = jnp.pad(w, ((0, self.K_pad - in_dim), (0, self.N_pad - out_dim)))
        bb = jnp.asarray(b, dtype=jnp.float32).reshape(1, out_dim)
        if self.N_pad != out_dim:
            bb = jnp.pad(bb, ((0, 0), (0, self.N_pad - out_dim)))
        self.w_pad = w
        self.b_pad = bb

        self._fn = jax.jit(self._forward)

    def __call__(self, x):
        return self._fn(x, self.w_pad, self.b_pad)

    def _forward(self, x, w_pad, b_pad):
        in_dim, out_dim = self.in_dim, self.out_dim
        lead = x.shape[:-1]
        out_dtype = x.dtype
        f32_out = jnp.dtype(out_dtype) == jnp.float32

        x2 = x.reshape(-1, in_dim)
        M = x2.shape[0]

        K_pad, N_pad = self.K_pad, self.N_pad
        tn, tk = self.tn, self.tk
        tm = min(self.tm_max, _round_up(M, 16))  # 16 covers bf16 sublane packing

        in_bytes = jnp.dtype(self.compute_dtype).itemsize
        out_bytes = jnp.dtype(out_dtype).itemsize
        tm, tn, tk = _shrink_tiles_for_vmem(
            tm, tn, tk, K_pad, in_bytes, out_bytes, f32_out,
            budget=int(self.vmem_limit_bytes * 0.9))

        M_pad = _round_up(M, tm)

        # Guarantee >=2 "parallel" output blocks so both v7x TensorCores work.
        if (M_pad // tm) * (N_pad // tn) == 1:
            if tn >= 256 and tn % 256 == 0:
                tn //= 2
            elif tm >= 32 and tm % 32 == 0:
                tm //= 2
                M_pad = _round_up(M, tm)

        k_steps = K_pad // tk

        # Per-call activation cast/pad only (weights were prepared at init).
        x2 = x2.astype(self.compute_dtype)
        if (M_pad, K_pad) != (M, in_dim):
            x2 = jnp.pad(x2, ((0, M_pad - M), (0, K_pad - in_dim)))

        cost = pl.CostEstimate(
            flops=2 * M * in_dim * out_dim,
            transcendentals=0,
            bytes_accessed=(M * in_dim + in_dim * out_dim) * in_bytes
            + out_dim * 4
            + M * out_dim * out_bytes,
        )

        if k_steps == 1:
            # Whole K resident: no reduction axis, no accumulator.
            out2 = pl.pallas_call(
                _linear_kernel_single_k,
                out_shape=jax.ShapeDtypeStruct((M_pad, N_pad), out_dtype),
                grid_spec=pltpu.PrefetchScalarGridSpec(
                    num_scalar_prefetch=0,
                    grid=(M_pad // tm, N_pad // tn),
                    in_specs=[
                        pl.BlockSpec((tm, tk), lambda i, j: (i, 0)),   # x tile
                        pl.BlockSpec((tk, tn), lambda i, j: (0, j)),   # W^T tile
                        pl.BlockSpec((1, tn), lambda i, j: (0, j)),    # bias tile
                    ],
                    out_specs=pl.BlockSpec((tm, tn), lambda i, j: (i, j)),
                ),
                compiler_params=pltpu.CompilerParams(
                    dimension_semantics=("parallel", "parallel"),
                    vmem_limit_bytes=self.vmem_limit_bytes,
                ),
                cost_estimate=cost,
            )(x2, w_pad, b_pad)
        else:
            kernel = (_linear_kernel_multi_k_accout if f32_out
                      else _linear_kernel_multi_k_scratch)
            scratch = [] if f32_out else [pltpu.VMEM((tm, tn), jnp.float32)]
            out2 = pl.pallas_call(
                kernel,
                out_shape=jax.ShapeDtypeStruct((M_pad, N_pad), out_dtype),
                grid_spec=pltpu.PrefetchScalarGridSpec(
                    num_scalar_prefetch=0,
                    grid=(M_pad // tm, N_pad // tn, k_steps),
                    in_specs=[
                        pl.BlockSpec((tm, tk), lambda i, j, k: (i, k)),  # x tile
                        pl.BlockSpec((tk, tn), lambda i, j, k: (k, j)),  # W^T tile
                        pl.BlockSpec((1, tn), lambda i, j, k: (0, j)),   # bias (k-invariant)
                    ],
                    out_specs=pl.BlockSpec((tm, tn), lambda i, j, k: (i, j)),
                    scratch_shapes=scratch,
                ),
                compiler_params=pltpu.CompilerParams(
                    dimension_semantics=("parallel", "parallel", "arbitrary"),
                    vmem_limit_bytes=self.vmem_limit_bytes,
                ),
                cost_estimate=cost,
            )(x2, w_pad, b_pad)

        out2 = out2[:M, :out_dim]
        return out2.reshape(*lead, out_dim)


def init_projection_params(key, in_dim, out_dim, dtype=jnp.float32):
    """Deterministic init mirroring torch.nn.Linear's uniform(-1/sqrt(in), 1/sqrt(in))."""
    kw, kb = jax.random.split(key)
    bound = 1.0 / math.sqrt(in_dim)
    # PyTorch weight is [out_dim, in_dim]; store it transposed for the kernel.
    weight = jax.random.uniform(kw, (out_dim, in_dim), dtype, -bound, bound)
    bias = jax.random.uniform(kb, (out_dim,), dtype, -bound, bound)
    return weight.T, bias  # ([in_dim, out_dim], [out_dim])


if __name__ == "__main__":
    key = jax.random.PRNGKey(0)
    k_x1, k_p1, k_x2, k_p2 = jax.random.split(key, 4)

    # --- Test 1: small projection, single-K path (batch=2, seq=8) ---
    batch, seq, in_dim, out_dim = 2, 8, 128, 256
    x = jax.random.normal(k_x1, (batch, seq, in_dim), jnp.float32)
    w_t, b = init_projection_params(k_p1, in_dim, out_dim)

    layer = ProjectionLayer(w_t, b)
    out = layer(x)
    jax.block_until_ready(out)

    ref = x @ w_t + b  # plain-JAX nn.Linear reference (f32)
    assert out.shape == (batch, seq, out_dim)
    assert jnp.allclose(out, ref, atol=5e-2, rtol=5e-2), "test 1 mismatch"

    # --- Test 2: ragged dims exercise M/K/N padding + multi-K accumulate-in-output ---
    batch2, seq2, in_dim2, out_dim2 = 3, 8, 200, 150
    x2 = jax.random.normal(k_x2, (batch2, seq2, in_dim2), jnp.float32)
    w_t2, b2 = init_projection_params(k_p2, in_dim2, out_dim2)

    layer2 = ProjectionLayer(w_t2, b2, tm=128, tn=128, tk=128)
    out2 = layer2(x2)
    jax.block_until_ready(out2)

    ref2 = x2 @ w_t2 + b2
    assert out2.shape == (batch2, seq2, out_dim2)
    assert jnp.allclose(out2, ref2, atol=5e-2, rtol=5e-2), "test 2 mismatch"

    print("KERNEL_OK")
</pallas_src>

<mosaic_0001>
module attributes {stable_mosaic.version = 11 : i64} {
  func.func @_linear_kernel_single_k(%arg0: i32, %arg1: i32, %arg2: memref<16x128xbf16, #tpu.memory_space<vmem>>, %arg3: memref<128x128xbf16, #tpu.memory_space<vmem>>, %arg4: memref<1x128xf32, #tpu.memory_space<vmem>>, %arg5: memref<16x128xf32, #tpu.memory_space<vmem>>) attributes {dimension_semantics = [#tpu.dimension_semantics<parallel>, #tpu.dimension_semantics<parallel>], iteration_bounds = array<i64: 1, 2>, scalar_prefetch = 0 : i64, scratch_operands = 0 : i64, tpu.core_type = #tpu.core_type<tc>, window_params = [{transform_indices = @transform_0, window_bounds = array<i64: 16, 128>}, {transform_indices = @transform_1, window_bounds = array<i64: 128, 128>}, {transform_indices = @transform_2, window_bounds = array<i64: 1, 128>}, {transform_indices = @transform_3, window_bounds = array<i64: 16, 128>}]} {
    %c0 = arith.constant 0 : index
    %c0_0 = arith.constant 0 : index
    %0 = vector.load %arg2[%c0, %c0_0] : memref<16x128xbf16, #tpu.memory_space<vmem>>, vector<16x128xbf16>
    %c0_1 = arith.constant 0 : index
    %c0_2 = arith.constant 0 : index
    %1 = vector.load %arg3[%c0_1, %c0_2] : memref<128x128xbf16, #tpu.memory_space<vmem>>, vector<128x128xbf16>
    %cst = arith.constant dense<0.000000e+00> : vector<16x128xf32>
    %2 = tpu.matmul %0, %1, %cst {dimension_numbers = #tpu.dot_dimension_numbers<[1], [0], [0], [1], [0, 0, 1, 1], [], []>} : vector<16x128xbf16>, vector<128x128xbf16>, vector<16x128xf32> -> vector<16x128xf32>
    %c0_3 = arith.constant 0 : index
    %c0_4 = arith.constant 0 : index
    %3 = vector.load %arg4[%c0_3, %c0_4] : memref<1x128xf32, #tpu.memory_space<vmem>>, vector<1x128xf32>
    %4 = vector.broadcast %3 : vector<1x128xf32> to vector<16x128xf32>
    %5 = arith.addf %2, %4 : vector<16x128xf32>
    %c0_5 = arith.constant 0 : index
    %c0_6 = arith.constant 0 : index
    %6 = vector.load %arg5[%c0_5, %c0_6] : memref<16x128xf32, #tpu.memory_space<vmem>>, vector<16x128xf32>
    tpu.vector_store %arg5[%c0_5, %c0_6], %5 {strides = array<i32>} : memref<16x128xf32, #tpu.memory_space<vmem>>, vector<16x128xf32>,
    return
  }
  func.func @transform_0(%arg0: i32, %arg1: i32) -> (i32, i32) {
    %c0_i32 = arith.constant 0 : i32
    %c0_i32_0 = arith.constant 0 : i32
    return %arg0, %c0_i32 : i32, i32
  }
  func.func @transform_1(%arg0: i32, %arg1: i32) -> (i32, i32) {
    %c0_i32 = arith.constant 0 : i32
    %c0_i32_0 = arith.constant 0 : i32
    return %c0_i32, %arg1 : i32, i32
  }
  func.func @transform_2(%arg0: i32, %arg1: i32) -> (i32, i32) {
    %c0_i32 = arith.constant 0 : i32
    %c0_i32_0 = arith.constant 0 : i32
    return %c0_i32, %arg1 : i32, i32
  }
  func.func @transform_3(%arg0: i32, %arg1: i32) -> (i32, i32) {
    %c0_i32 = arith.constant 0 : i32
    return %arg0, %arg1 : i32, i32
  }
}

</mosaic_0001>

<bundles_post_ra>
// kernel: _forward.1
= control target key start
LH: loop header
LB: loop body
LE: loop exit
PB: predicated region body
PF: predicated region fallthrough
CT: control target
= control target key end

     0   :  { %8 = vsyncpa [#allocation3], 0  ;;  %s943_s0 = inlined_call_operand.vmem [shape: bf16[16,128], index: 0, kind: input, shape index: {}]   ;;  %s944_s1 = inlined_call_operand.hbm [shape: bf16[128,256], index: 1, kind: input, shape index: {}]   ;;  %s945_s2 = inlined_call_operand.vmem [shape: f32[1,256], index: 2, kind: input, shape index: {}]   ;;  %s946_s3 = inlined_call_operand.hbm [shape: f32[16,256], index: 3, kind: output, shape index: {}]  }
   0x1   :  { %10 = vsyncpa [#allocation3 + $0x1], 0 }
   0x2   :  { %11 = vsyncpa [#allocation4], 0 }
   0x3   :  { %13 = vsyncpa [#allocation4 + $0x1], 0  ;;  %s761_s12 = smov 0   ;;  %s763_s13 = smov 0  }
   0x4   :  { %s765_s14 = smov 0   ;;  %s767_s15 = smov 0  }
   0x5   :  { %s769_s16 = smov 0   ;;  %s771_s17 = smov 0  }
   0x6 LB: > { %s485_s18 = sadd.s32 4294967295, %s729_s17   ;;  %s486_s19 = sadd.s32 4294967294, %s729_s17   ;;  %s729_s17 = sphi %s771_s17, %s19_s17   ;;  %s725_s16 = sphi %s769_s16, %s960_s16   ;;  %s721_s15 = sphi %s767_s15, %s959_s15   ;;  %s717_s14 = sphi %s765_s14, %s958_s14   ;;  %s713_s13 = sphi %s763_s13, %s957_s13   ;;  %s709_s12 = sphi %s761_s12, %s956_s12  }
   0x7   : > { %s28_s20 = sadd.s32 1, %s725_s16  ;;  %s64_s21 = sadd.s32 1, %s717_s14 }
   0x8   : > { %p29_p0 = scmp.ge.s32.totalorder %s28_s20, 2  ;;  %p71_p1 = scmp.ne.s32.totalorder %s717_s14, %s713_s13 }
   0x9   : > { %p72_p2 = scmp.eq.s32.totalorder %s729_s17, 0  ;;  %p77_p3 = scmp.ne.s32.totalorder %s713_s13, %s709_s12 }
   0xa   : > { %s962_s20 = smov (%p29_p0, %s28_s20), 0  ;;  %p78_p5 = scmp.eq.s32.totalorder %s485_s18, 0 }
   0xb   : > { %p802_p4 = por %p72_p2, %p71_p1  ;;  %s61_s23 = ssub.s32 %s725_s16, %s962_s20 }
   0xc   : > { %p129_p6 = scmp.eq.s32.totalorder %s485_s18, 1  ;;  %p62_p7 = scmp.eq.s32.totalorder %s61_s23, 0 }
   0xd   : > { %p808_p8 = por %p78_p5, %p77_p3  ;;  %p135_p10 = scmp.eq.s32.totalorder %s486_s19, 1 }
   0xe   : > { %p812_p9 = por %p129_p6, %p71_p1  ;;  %p550_p13 = scmp.lt.s32.totalorder %s729_s17, 2 }
   0xf   : > { %s817_s26 = scalar_select %p62_p7, %s717_s14, %s64_s21  }
  0x10   : > { %s950_s25 = scalar_select %p812_p9, 1, 0 }
  0x11   : > { %p819_p11 = por %p135_p10, %p77_p3  ;;  %s164_s28 = sand.u32 1, %s717_s14  }
  0x12   : > { %s490_s29 = sshll.u32 %s164_s28, 6  ;;  %s491_s30 = sshll.u32 %s725_s16, 6 }
  0x13   : > { %s951_s27 = scalar_select %p819_p11, 1, 0 }
  0x14   : > { %s830_s6 = scalar_lea.hbm %s944_s1, %s491_s30  ;;  %s168_s7 = scalar_lea.vmem [#allocation2], %s490_s29 }
  0x15   : > { %s174_s8 = sshll.u32 %s168_s7, 4  ;;  %p836_p0 = pnand %p550_p13, %p802_p4  ;;  %s832_s8 = int_to_ptr.vmem [resolvable:$true] %s174_s8 }
  0x16   : > { %s840_s10 = scalar_lea.sflag [#allocation3], %s164_s28  ;;  %s617_s11 = scalar_lea.hbm %s830_s6, 1024 }
  0x17   : > { %p618_p1 = scmp.ne.s32.totalorder %s830_s6, %s617_s11  ;;  %p619_p2 = pneg %p836_p0 }
  0x18   : > { %s622_s21 = scalar_lea.hbm %s944_s1, 2048  ;;  %p623_p4 = scmp.lt.u32.totalorder %s830_s6, %s944_s1 }
  0x19   : > { %p620_p3 = pnand %p619_p2, %p618_p1  ;;  %p624_p6 = scmp.lt.u32.totalorder %s622_s21, %s617_s11 }
  0x1a   : > { %p626_p10 = scmp.lt.u32.totalorder %s617_s11, %s830_s6 }
  0x1b   : > { %p621_p5 = pneg %p620_p3  ;;  %p625_p7 = por %p624_p6, %p623_p4 }
  0x1d   : > { %p627_p13 = por %p626_p10, %p625_p7 }
  0x1f   : > { %p628_p12 = pnand %p627_p13, %p621_p5 }
  0x21   : > { %631 = shalt.err (!%p628_p12)
}
  0x22   : > { %s632_s28 = scalar_lea.vmem %s832_s8, 1024  ;;  %s731_s29 = smov [#allocation2]  }
  0x23   : > { %p633_p1 = scmp.ne.s32.totalorder %s832_s8, %s632_s28  ;;  %s637_s30 = sshll.u32 %s731_s29, 4  ;;  %s638_s30 = int_to_ptr.vmem [resolvable:$false] %s637_s30 }
  0x24   : > { %s639_s4 = scalar_lea.vmem %s638_s30, 2048  ;;  %p640_p9 = scmp.lt.s32.totalorder %s832_s8, %s638_s30 }
  0x25   : > { %p635_p3 = pnand %p633_p1, %p619_p2  ;;  %p641_p4 = scmp.lt.s32.totalorder %s639_s4, %s632_s28 }
  0x27   : > { %p636_p11 = pneg %p635_p3  ;;  %p642_p6 = por %p641_p4, %p640_p9 }
  0x29   : > { %p643_p7 = pnand %p642_p6, %p636_p11 }
  0x2b   : > { %646 = shalt.err (!%p643_p7)
}
  0x2c   : > { %s732_s5 = smov 128   ;;  %s733_s7 = smov 64  }
  0x2d   : > { %s734_s11 = smov 4   ;;  %p492_p12 = scmp.ge.s32.totalorder %s729_s17, 1 }
  0x2e   : > { %545 = dma.hbm_to_vmem [thread:$0]  (!%p836_p0), %s830_s6, 1024, %s832_s8, %s840_s10, %s732_s5, %s733_s7, %s734_s11  }
  0x2f   : > { %p188_p2 = scmp.lt.s32.totalorder %s729_s17, 3 }
  0x31   : > { %p189_p5 = pnand %p492_p12, %p188_p2 }
  0x32   : > { %s871_s18 = sand.u32 (!%p189_p5), 1, %s713_s13  }
  0x33   : > { %192 = sbr.rel (%p189_p5) target bundleno = 324 (0x144), region = 32  ;;  %s493_s19 = sshll.u32 (!%p189_p5), %s871_s18, 6 }
  0x34   : > { %s195_s21 = scalar_lea.sflag (!%p189_p5), [#allocation3], %s871_s18  ;;  %s198_s22 = scalar_lea.vmem (!%p189_p5), [#allocation2], %s493_s19 }
  0x3a   : > { %700 = dma.done.wait (%p808_p8), %s195_s21, 1024  }
  0x3b   : > { %702 = vsyncadd (%p808_p8), %s195_s21, 4294966272  ;;  %v735_v0 = vmov 0.0   ;;  %vm736_vm0 = vmmov 0   ;;  %v608_v1 = vld [vmem:[%s198_s22] sm:$0xff]   ;;  %v609_v2 = vld [vmem:[%s198_s22 + $0x8] sm:$0xff]   ;;  %p235_p8 = scmp.lt.s32.totalorder %s721_s15, 1 }
  0x3c   : > { %518 = vmatprep.subr.bf16.mxu0 %v735_v0  ;;  %534 = vmatprep.mubr.msk.bf16.mxu0 %vm736_vm0, %v735_v0  ;;  %v610_v3 = vld [vmem:[%s198_s22 + $0x10] sm:$0xff]   ;;  %v611_v4 = vld [vmem:[%s198_s22 + $0x18] sm:$0xff]   ;;  %v612_v5 = vld [vmem:[%s198_s22 + $0x20] sm:$0xff]   ;;  %s494_s9 = sshll.u32 %s871_s18, 4  ;;  %s506_s4 = sshll.u32 %s721_s15, 7 }
  0x3d   : > { %519 = vmatpush3.bf16.msra.mxu0 %v608_v1  ;;  %v613_v6 = vld [vmem:[%s198_s22 + $0x28] sm:$0xff]   ;;  %v614_v7 = vld [vmem:[%s198_s22 + $0x30] sm:$0xff]   ;;  %v615_v8 = vld [vmem:[%s198_s22 + $0x38] sm:$0xff]   ;;  %s236_s8 = scalar_select %p235_p8, %s721_s15, 1 }
  0x3e   : > { %520 = vmatprep.subr.bf16.mxu0 %v735_v0  ;;  %v616_v9 = vld [vmem:[%s943_s0] sm:$0xff]   ;;  %s228_s29 = scalar_lea.vmem [#allocation5], %s494_s9  ;;  %s894_s11 = scalar_lea.hbm %s946_s3, %s506_s4 }
  0x3f   : > { %s237_s28 = scalar_lea.vmem %s945_s2, %s236_s8  ;;  %s378_s30 = sshll.u32 %s228_s29, 4  ;;  %s889_s30 = int_to_ptr.vmem [resolvable:$true] %s378_s30 }
  0x40   : > { %v495_v10 = vld [vmem:[%s237_s28] ss:$0 sm:$0xff]  ;;  %s363_s19 = scalar_lea.sflag [#allocation4], %s871_s18  ;;  %s647_s15 = scalar_lea.vmem %s889_s30, 256 }
  0x41   : > { %521 = vmatpush3.bf16.msra.mxu0 %v609_v2  ;;  %p648_p9 = scmp.ne.s32.totalorder %s889_s30, %s647_s15  ;;  %p953_p11 = scmp.ne.s32.totalorder %s950_s25, 0 }
  0x42   : > { %522 = vmatprep.subr.bf16.mxu0 %v735_v0  ;;  %s737_s21 = smov [#allocation5]  }
  0x43   : > { %p649_p0 = pnand %p648_p9, %p953_p11  ;;  %s651_s22 = sshll.u32 %s737_s21, 4  ;;  %s652_s22 = int_to_ptr.vmem [resolvable:$false] %s651_s22 }
  0x44   : > { %s653_s24 = scalar_lea.vmem %s652_s22, 512  ;;  %p654_p13 = scmp.lt.s32.totalorder %s889_s30, %s652_s22 }
  0x45   : > { %523 = vmatpush3.bf16.msra.mxu0 %v610_v3  ;;  %p650_p10 = pneg %p649_p0  ;;  %p655_p1 = scmp.lt.s32.totalorder %s653_s24, %s647_s15 }
  0x46   : > { %524 = vmatprep.subr.bf16.mxu0 %v735_v0 }
  0x47   : > { %p656_p3 = por %p655_p1, %p654_p13 }
  0x49   : > { %525 = vmatpush3.bf16.msra.mxu0 %v611_v4  ;;  %p657_p4 = pnand %p656_p3, %p650_p10 }
  0x4a   : > { %526 = vmatprep.subr.bf16.mxu0 %v735_v0 }
  0x4d   : > { %527 = vmatpush3.bf16.msra.mxu0 %v612_v5 }
  0x4e   : > { %528 = vmatprep.subr.bf16.mxu0 %v735_v0 }
  0x51   : > { %529 = vmatpush3.bf16.msra.mxu0 %v613_v6 }
  0x52   : > { %530 = vmatprep.subr.bf16.mxu0 %v735_v0 }
  0x55   : > { %531 = vmatpush3.bf16.msra.mxu0 %v614_v7 }
  0x56   : > { %532 = vmatprep.subr.bf16.mxu0 %v735_v0 }
  0x59   : > { %533 = vmatpush3.bf16.msra.mxu0 %v615_v8 }
  0x5c   : > { %535 = vmatmul.mubr.bf16.vlgmr.msra.gmra.mrb[0].mxu0 %v616_v9 }
 0x12f   : > { %v353_v11 = vpop.f32.mrb[0].mxu0 }
 0x130   : > { %v354_v12 = vadd.f32 %v495_v10, %v353_v11  ;;  %v536_v13 = vpop.f32.mrb[1].mxu0 }
 0x131   : > { %v356_v14 = vpop.f32.mrb[2].mxu0 }
 0x132   : > { %360 = vst [vmem:[%s228_s29] sm:$0xff] %v354_v12  ;;  %v357_v15 = vadd.f32 %v495_v10, %v356_v14  ;;  %v537_v16 = vpop.f32.mrb[3].mxu0 }
 0x134   : > { %361 = vst [vmem:[%s228_s29 + $0x8] sm:$0xff] %v357_v15 }
 0x135   : > { %660 = shalt.err (!%p657_p4)
}
 0x136   : > { %s661_s6 = scalar_lea.hbm %s894_s11, 256  ;;  %s665_s10 = scalar_lea.hbm %s946_s3, 512 }
 0x137   : > { %p662_p6 = scmp.ne.s32.totalorder %s894_s11, %s661_s6  ;;  %p666_p2 = scmp.lt.u32.totalorder %s894_s11, %s946_s3 }
 0x138   : > { %p667_p5 = scmp.lt.u32.totalorder %s665_s10, %s661_s6  ;;  %p669_p9 = scmp.lt.u32.totalorder %s661_s6, %s894_s11 }
 0x139   : > { %p663_p7 = pnand %p662_p6, %p953_p11 }
 0x13a   : > { %p668_p8 = por %p667_p5, %p666_p2 }
 0x13b   : > { %p664_p12 = pneg %p663_p7 }
 0x13c   : > { %p670_p0 = por %p669_p9, %p668_p8 }
 0x13e   : > { %p671_p10 = pnand %p670_p0, %p664_p12 }
 0x140   : > { %674 = shalt.err (!%p671_p10)
}
 0x141   : > { %s738_s29 = smov 128   ;;  %s739_s4 = smov 256  }
 0x142   : > { %s740_s5 = smov 8  }
 0x143   : > { %540 = dma.vmem_to_hbm [thread:$0]  (%p953_p11), %s889_s30, 256, %s894_s11, %s363_s19, %s738_s29, %s739_s4, %s740_s5  }
 0x144 PF: > { %s393_s7 = sand.u32 1, %s709_s12   ;;  %p954_p13 = scmp.ne.s32.totalorder %s951_s27, 0 }
 0x145   : > { %p955_p1 = scmp.ge.s32.totalorder %s729_s17, 2  ;;  %s394_s15 = scalar_lea.sflag [#allocation4], %s393_s7 }
 0x147   : > { %p547_p3 = pnand %p955_p1, %p954_p13 }
 0x149   : > { %704 = dma.done.wait (!%p547_p3), %s394_s15, 256  }
 0x14a   : > { %706 = vsyncadd (!%p547_p3), %s394_s15, 4294967040  ;;  %s19_s17 = sadd.s32 1, %s729_s17   ;;  %s956_s12 = smov %s713_s13 }
 0x14b   : > { %p16_p4 = scmp.ge.s32.totalorder %s19_s17, 4   ;;  %s957_s13 = smov %s717_s14 }
 0x14c   : > { %s958_s14 = smov %s817_s26  ;;  %s959_s15 = smov %s725_s16 }
 0x14d   : > { %s960_s16 = smov %s962_s20  ;;  %18 = sbr.rel (!%p16_p4) target bundleno = 6 (0x6), region = 83 }
 0x154   :  { %399 = vsyncpa [#allocation3], 1 }
 0x155   :  { %401 = vsyncpa [#allocation3 + $0x1], 1 }
 0x156   :  { %402 = vsyncpa [#allocation4], 1 }
 0x157   :  { %404 = vsyncpa [#allocation4 + $0x1], 1 }

</bundles_post_ra>
